<compile_context>
chip_gen: v7x
topology: tpu7x:2x2x1
jax: 0.10.0
libtpu: 0.0.40
codegen_flags: <defaults>
</compile_context>

<pallas_src>
import jax
import jax.numpy as jnp
from jax.experimental import pallas as pl
from jax.experimental.pallas import tpu as pltpu

EPS = 1e-5  # nn.BatchNorm1d default


# --------------------------------- kernel ---------------------------------

def _dot_bf16(x, w):
    """MXU matmul: bf16 operands, f32 accumulation."""
    return jnp.dot(x.astype(jnp.bfloat16), w.astype(jnp.bfloat16),
                   preferred_element_type=jnp.float32)


def _bn_relu_per_view(a, g, be, batch):
    """BatchNorm1d (training mode, biased batch stats) + ReLU, stats per view.

    `a` is (2*batch, D) with view-1 rows first (each encoder call in the PyTorch
    reference is its own BN batch). Uses a (2, batch, D) reshape instead of
    slice+concat so it stays layout-friendly.
    """
    d = a.shape[-1]
    a3 = a.reshape(2, batch, d)
    mean = jnp.mean(a3, axis=1, keepdims=True)
    diff = a3 - mean
    var = jnp.mean(diff * diff, axis=1, keepdims=True)
    xhat = diff * jax.lax.rsqrt(var + EPS)
    y = jnp.maximum(xhat * g + be, 0.0)          # g, be: (1, D) broadcast over (2, B, D)
    return y.reshape(2 * batch, d)


def _byol_fused_kernel(x_ref, w1_ref, w2_ref, wp1_ref, wp2_ref, pw_ref, vec_ref,
                       out_ref):
    two_b = x_ref.shape[0]
    batch = two_b // 2
    two_hidden = w1_ref.shape[1]      # online || target fused on lanes
    two_proj = w2_ref.shape[1]
    proj = pw_ref.shape[1]

    x = x_ref[...]                    # (2B, input_dim) bf16, x1 rows over x2 rows

    # Packed per-column vectors (f32), one slab -> one DMA.
    g1 = vec_ref[0:1, :two_hidden]
    be1 = vec_ref[1:2, :two_hidden]
    g2 = vec_ref[2:3, :two_proj]
    be2 = vec_ref[3:4, :two_proj]
    bp1 = vec_ref[4:5, :two_proj]
    bp2 = vec_ref[5:6, :two_proj]
    pdb1 = vec_ref[6:7, :proj]
    pdb2 = vec_ref[7:8, :proj]

    # Backbone layer 1: shared-input matmul, online||target fused on the lane axis.
    # (Pre-BN Linear biases are dropped: BN mean-subtraction cancels them exactly.)
    a1 = _bn_relu_per_view(_dot_bf16(x, w1_ref[...]), g1, be1, batch)     # (2B, 2H)

    # Backbone layer 2: block-diagonal online/target weights.
    h = _bn_relu_per_view(_dot_bf16(a1, w2_ref[...]), g2, be2, batch)     # (2B, 2P)

    # Projector (block-diagonal): Linear + ReLU, Linear.
    q = jnp.maximum(_dot_bf16(h, wp1_ref[...]) + bp1, 0.0)
    z = _dot_bf16(q, wp2_ref[...]) + bp2                                  # [z_online || z_target]

    z_o = z[:, :proj]
    z_t = z[:, proj:]

    # Predictor (online branch only).
    pa = jnp.maximum(_dot_bf16(z_o, pw_ref[:proj, :]) + pdb1, 0.0)
    p = _dot_bf16(pa, pw_ref[proj:, :]) + pdb2                            # (2B, P)

    # Lane-dense packed output: [p || z_t] -> (2B, 2*proj), one unmasked-store slab.
    out_ref[...] = jnp.concatenate([p, z_t], axis=1).astype(out_ref.dtype)


# --------------------------------- wrapper ---------------------------------

def _block_diag(a, b):
    m1, n1 = a.shape
    m2, n2 = b.shape
    top = jnp.concatenate([a, jnp.zeros((m1, n2), a.dtype)], axis=1)
    bot = jnp.concatenate([jnp.zeros((m2, n1), b.dtype), b], axis=1)
    return jnp.concatenate([top, bot], axis=0)


def byol_forward(x1, x2, online, predictor, target):
    """Matches BYOL.forward: returns (p1, p2, z1_t, z2_t)."""
    batch, input_dim = x1.shape
    hidden = online["w1"].shape[1]
    proj = online["wp2"].shape[1]
    bf16 = jnp.bfloat16

    # ---- fused / block-diagonal bf16 weight slabs --------------------------
    w1cat = jnp.concatenate([online["w1"], target["w1"]], axis=1).astype(bf16)   # (in, 2H)
    w2bd = _block_diag(online["w2"], target["w2"]).astype(bf16)                  # (2H, 2P)
    wp1bd = _block_diag(online["wp1"], target["wp1"]).astype(bf16)               # (2P, 2P)
    wp2bd = _block_diag(online["wp2"], target["wp2"]).astype(bf16)               # (2P, 2P)
    pwcat = jnp.concatenate([predictor["w1"], predictor["w2"]], axis=0).astype(bf16)  # (2P, P)

    # ---- one f32 vector slab for every gamma / beta / bias -----------------
    width = max(2 * hidden, 2 * proj)

    def row(v):
        return jnp.pad(v, ((0, 0), (0, width - v.shape[1])))

    vec = jnp.concatenate([
        row(jnp.concatenate([online["g1"], target["g1"]], axis=1)),
        row(jnp.concatenate([online["be1"], target["be1"]], axis=1)),
        row(jnp.concatenate([online["g2"], target["g2"]], axis=1)),
        row(jnp.concatenate([online["be2"], target["be2"]], axis=1)),
        row(jnp.concatenate([online["bp1"], target["bp1"]], axis=1)),
        row(jnp.concatenate([online["bp2"], target["bp2"]], axis=1)),
        row(predictor["b1"]),
        row(predictor["b2"]),
    ], axis=0).astype(jnp.float32)                                               # (8, width)

    x12 = jnp.concatenate([x1, x2], axis=0).astype(bf16)                         # (2B, in)

    args = (x12, w1cat, w2bd, wp1bd, wp2bd, pwcat, vec)

    flops = 2 * (2 * batch) * (input_dim * 2 * hidden
                               + 2 * hidden * 2 * proj
                               + 2 * (2 * proj) * (2 * proj)
                               + 2 * proj * proj)
    bytes_accessed = (sum(int(a.size) * a.dtype.itemsize for a in args)
                      + 2 * batch * 2 * proj * 4)

    vmem = pl.BlockSpec(memory_space=pltpu.MemorySpace.VMEM)
    out = pl.pallas_call(
        _byol_fused_kernel,
        out_shape=jax.ShapeDtypeStruct((2 * batch, 2 * proj), jnp.float32),
        in_specs=[vmem] * len(args),
        out_specs=vmem,
        cost_estimate=pl.CostEstimate(flops=flops, transcendentals=0,
                                      bytes_accessed=bytes_accessed),
    )(*args)

    p1, p2 = out[:batch, :proj], out[batch:, :proj]
    z1_t, z2_t = out[:batch, proj:], out[batch:, proj:]
    # target branch is under torch.no_grad() / .detach() in the reference
    return p1, p2, jax.lax.stop_gradient(z1_t), jax.lax.stop_gradient(z2_t)


# -------------------- pure-JAX reference (spec, f32) --------------------

def _bn_relu_ref(a, g, be):
    mean = jnp.mean(a, axis=0, keepdims=True)
    var = jnp.mean((a - mean) ** 2, axis=0, keepdims=True)
    return jnp.maximum((a - mean) * jax.lax.rsqrt(var + EPS) * g + be, 0.0)


def _encoder_ref(x, p):
    # Reference keeps the pre-BN biases (the kernel drops them; BN cancels them).
    a1 = _bn_relu_ref(x @ p["w1"] + p["b1"], p["g1"], p["be1"])
    h = _bn_relu_ref(a1 @ p["w2"] + p["b2"], p["g2"], p["be2"])
    q = jnp.maximum(h @ p["wp1"] + p["bp1"], 0.0)
    return q @ p["wp2"] + p["bp2"]


def byol_forward_ref(x1, x2, online, predictor, target):
    def pred(z):
        a = jnp.maximum(z @ predictor["w1"] + predictor["b1"], 0.0)
        return a @ predictor["w2"] + predictor["b2"]

    p1 = pred(_encoder_ref(x1, online))
    p2 = pred(_encoder_ref(x2, online))
    z1_t = _encoder_ref(x1, target)
    z2_t = _encoder_ref(x2, target)
    return p1, p2, z1_t, z2_t


# ------------------------- deterministic parameter init -------------------------

def _linear_init(key, fan_in, fan_out):
    # Weight stored as (in, out) so the kernel computes x @ W + b.
    kw, kb = jax.random.split(key)
    bound = 1.0 / jnp.sqrt(fan_in)
    w = jax.random.uniform(kw, (fan_in, fan_out), jnp.float32, -bound, bound)
    b = jax.random.uniform(kb, (1, fan_out), jnp.float32, -bound, bound)
    return w, b


def make_encoder_params(key, input_dim, hidden_dim, proj_dim):
    k1, k2, k3, k4 = jax.random.split(key, 4)
    w1, b1 = _linear_init(k1, input_dim, hidden_dim)   # b1/b2 exist in the PyTorch
    w2, b2 = _linear_init(k2, hidden_dim, proj_dim)    # module but are BN no-ops.
    wp1, bp1 = _linear_init(k3, proj_dim, proj_dim)
    wp2, bp2 = _linear_init(k4, proj_dim, proj_dim)
    return dict(
        w1=w1, b1=b1,
        g1=jnp.ones((1, hidden_dim), jnp.float32), be1=jnp.zeros((1, hidden_dim), jnp.float32),
        w2=w2, b2=b2,
        g2=jnp.ones((1, proj_dim), jnp.float32), be2=jnp.zeros((1, proj_dim), jnp.float32),
        wp1=wp1, bp1=bp1, wp2=wp2, bp2=bp2,
    )


def make_predictor_params(key, proj_dim):
    k1, k2 = jax.random.split(key)
    w1, b1 = _linear_init(k1, proj_dim, proj_dim)
    w2, b2 = _linear_init(k2, proj_dim, proj_dim)
    return dict(w1=w1, b1=b1, w2=w2, b2=b2)


if __name__ == "__main__":
    # batch kept a multiple of 8 (f32 sublane tile) so the per-view reshapes are free.
    batch, input_dim, hidden_dim, proj_dim = 8, 32, 128, 64

    root = jax.random.PRNGKey(0)
    k_online, k_target, k_pred, k_x1, k_x2 = jax.random.split(root, 5)

    online = make_encoder_params(k_online, input_dim, hidden_dim, proj_dim)
    target = make_encoder_params(k_target, input_dim, hidden_dim, proj_dim)
    predictor = make_predictor_params(k_pred, proj_dim)

    x1 = jax.random.normal(k_x1, (batch, input_dim), jnp.float32)
    x2 = jax.random.normal(k_x2, (batch, input_dim), jnp.float32)

    fwd = jax.jit(lambda a, b: byol_forward(a, b, online, predictor, target))
    p1, p2, z1_t, z2_t = fwd(x1, x2)
    jax.block_until_ready((p1, p2, z1_t, z2_t))

    assert p1.shape == (batch, proj_dim) and p2.shape == (batch, proj_dim)
    assert z1_t.shape == (batch, proj_dim) and z2_t.shape == (batch, proj_dim)
    assert bool(jnp.all(jnp.isfinite(p1))) and bool(jnp.all(jnp.isfinite(z1_t)))

    # Correctness vs. the full f32 reference (bf16 MXU operands -> loose tolerance).
    r1, r2, rz1, rz2 = byol_forward_ref(x1, x2, online, predictor, target)
    max_err = max(float(jnp.max(jnp.abs(p1 - r1))), float(jnp.max(jnp.abs(p2 - r2))),
                  float(jnp.max(jnp.abs(z1_t - rz1))), float(jnp.max(jnp.abs(z2_t - rz2))))
    assert max_err < 0.25, f"max abs error vs reference too large: {max_err}"

    print("KERNEL_OK")
</pallas_src>

<mosaic_0001>
module attributes {stable_mosaic.version = 11 : i64} {
  func.func @_byol_fused_kernel(%arg0: memref<16x32xbf16, #tpu.memory_space<vmem>>, %arg1: memref<32x256xbf16, #tpu.memory_space<vmem>>, %arg2: memref<256x128xbf16, #tpu.memory_space<vmem>>, %arg3: memref<128x128xbf16, #tpu.memory_space<vmem>>, %arg4: memref<128x128xbf16, #tpu.memory_space<vmem>>, %arg5: memref<128x64xbf16, #tpu.memory_space<vmem>>, %arg6: memref<8x256xf32, #tpu.memory_space<vmem>>, %arg7: memref<16x128xf32, #tpu.memory_space<vmem>>) attributes {dimension_semantics = [], scalar_prefetch = 0 : i64, scratch_operands = 0 : i64, tpu.core_type = #tpu.core_type<tc>} {
    %c0 = arith.constant 0 : index
    %c0_0 = arith.constant 0 : index
    %0 = vector.load %arg0[%c0, %c0_0] : memref<16x32xbf16, #tpu.memory_space<vmem>>, vector<16x32xbf16>
    %c0_1 = arith.constant 0 : index
    %c0_2 = arith.constant 0 : index
    %1 = vector.load %arg6[%c0_1, %c0_2] : memref<8x256xf32, #tpu.memory_space<vmem>>, vector<1x256xf32>
    %c1 = arith.constant 1 : index
    %c0_3 = arith.constant 0 : index
    %2 = vector.load %arg6[%c1, %c0_3] : memref<8x256xf32, #tpu.memory_space<vmem>>, vector<1x256xf32>
    %c2 = arith.constant 2 : index
    %c0_4 = arith.constant 0 : index
    %3 = vector.load %arg6[%c2, %c0_4] : memref<8x256xf32, #tpu.memory_space<vmem>>, vector<1x128xf32>
    %c3 = arith.constant 3 : index
    %c0_5 = arith.constant 0 : index
    %4 = vector.load %arg6[%c3, %c0_5] : memref<8x256xf32, #tpu.memory_space<vmem>>, vector<1x128xf32>
    %c4 = arith.constant 4 : index
    %c0_6 = arith.constant 0 : index
    %5 = vector.load %arg6[%c4, %c0_6] : memref<8x256xf32, #tpu.memory_space<vmem>>, vector<1x128xf32>
    %c5 = arith.constant 5 : index
    %c0_7 = arith.constant 0 : index
    %6 = vector.load %arg6[%c5, %c0_7] : memref<8x256xf32, #tpu.memory_space<vmem>>, vector<1x128xf32>
    %c6 = arith.constant 6 : index
    %c0_8 = arith.constant 0 : index
    %7 = vector.load %arg6[%c6, %c0_8] : memref<8x256xf32, #tpu.memory_space<vmem>>, vector<1x64xf32>
    %c7 = arith.constant 7 : index
    %c0_9 = arith.constant 0 : index
    %8 = vector.load %arg6[%c7, %c0_9] : memref<8x256xf32, #tpu.memory_space<vmem>>, vector<1x64xf32>
    %c0_10 = arith.constant 0 : index
    %c0_11 = arith.constant 0 : index
    %9 = vector.load %arg1[%c0_10, %c0_11] : memref<32x256xbf16, #tpu.memory_space<vmem>>, vector<32x256xbf16>
    %cst = arith.constant dense<0.000000e+00> : vector<16x256xf32>
    %10 = tpu.matmul %0, %9, %cst {dimension_numbers = #tpu.dot_dimension_numbers<[1], [0], [0], [1], [0, 0, 1, 1], [], []>} : vector<16x32xbf16>, vector<32x256xbf16>, vector<16x256xf32> -> vector<16x256xf32>
    %11 = vector.shape_cast %10 : vector<16x256xf32> to vector<2x8x256xf32>
    %cst_12 = arith.constant dense<0.000000e+00> : vector<2x256xf32>
    %12 = vector.multi_reduction <add>, %11, %cst_12 [1] : vector<2x8x256xf32> to vector<2x256xf32>
    %13 = vector.shape_cast %12 : vector<2x256xf32> to vector<2x1x256xf32>
    %cst_13 = arith.constant 8.000000e+00 : f32
    %14 = vector.broadcast %cst_13 : f32 to vector<2x1x256xf32>
    %15 = arith.divf %13, %14 : vector<2x1x256xf32>
    %16 = vector.broadcast %15 : vector<2x1x256xf32> to vector<2x8x256xf32>
    %17 = arith.subf %11, %16 : vector<2x8x256xf32>
    %18 = arith.mulf %17, %17 : vector<2x8x256xf32>
    %cst_14 = arith.constant dense<0.000000e+00> : vector<2x256xf32>
    %19 = vector.multi_reduction <add>, %18, %cst_14 [1] : vector<2x8x256xf32> to vector<2x256xf32>
    %20 = vector.shape_cast %19 : vector<2x256xf32> to vector<2x1x256xf32>
    %cst_15 = arith.constant 8.000000e+00 : f32
    %21 = vector.broadcast %cst_15 : f32 to vector<2x1x256xf32>
    %22 = arith.divf %20, %21 : vector<2x1x256xf32>
    %cst_16 = arith.constant 9.99999974E-6 : f32
    %23 = vector.broadcast %cst_16 : f32 to vector<2x1x256xf32>
    %24 = arith.addf %22, %23 : vector<2x1x256xf32>
    %25 = math.rsqrt %24 : vector<2x1x256xf32>
    %26 = vector.broadcast %25 : vector<2x1x256xf32> to vector<2x8x256xf32>
    %27 = arith.mulf %17, %26 : vector<2x8x256xf32>
    %28 = vector.shape_cast %1 : vector<1x256xf32> to vector<1x1x256xf32>
    %29 = vector.broadcast %28 : vector<1x1x256xf32> to vector<2x8x256xf32>
    %30 = arith.mulf %27, %29 : vector<2x8x256xf32>
    %31 = vector.shape_cast %2 : vector<1x256xf32> to vector<1x1x256xf32>
    %32 = vector.broadcast %31 : vector<1x1x256xf32> to vector<2x8x256xf32>
    %33 = arith.addf %30, %32 : vector<2x8x256xf32>
    %cst_17 = arith.constant 0.000000e+00 : f32
    %34 = vector.broadcast %cst_17 : f32 to vector<2x8x256xf32>
    %35 = arith.maximumf %33, %34 : vector<2x8x256xf32>
    %36 = vector.shape_cast %35 : vector<2x8x256xf32> to vector<16x256xf32>
    %c0_18 = arith.constant 0 : index
    %c0_19 = arith.constant 0 : index
    %37 = vector.load %arg2[%c0_18, %c0_19] : memref<256x128xbf16, #tpu.memory_space<vmem>>, vector<256x128xbf16>
    %38 = arith.truncf %36 : vector<16x256xf32> to vector<16x256xbf16>
    %cst_20 = arith.constant dense<0.000000e+00> : vector<16x128xf32>
    %39 = tpu.matmul %38, %37, %cst_20 {dimension_numbers = #tpu.dot_dimension_numbers<[1], [0], [0], [1], [0, 0, 1, 1], [], []>} : vector<16x256xbf16>, vector<256x128xbf16>, vector<16x128xf32> -> vector<16x128xf32>
    %40 = vector.shape_cast %39 : vector<16x128xf32> to vector<2x8x128xf32>
    %cst_21 = arith.constant dense<0.000000e+00> : vector<2x128xf32>
    %41 = vector.multi_reduction <add>, %40, %cst_21 [1] : vector<2x8x128xf32> to vector<2x128xf32>
    %42 = vector.shape_cast %41 : vector<2x128xf32> to vector<2x1x128xf32>
    %cst_22 = arith.constant 8.000000e+00 : f32
    %43 = vector.broadcast %cst_22 : f32 to vector<2x1x128xf32>
    %44 = arith.divf %42, %43 : vector<2x1x128xf32>
    %45 = vector.broadcast %44 : vector<2x1x128xf32> to vector<2x8x128xf32>
    %46 = arith.subf %40, %45 : vector<2x8x128xf32>
    %47 = arith.mulf %46, %46 : vector<2x8x128xf32>
    %cst_23 = arith.constant dense<0.000000e+00> : vector<2x128xf32>
    %48 = vector.multi_reduction <add>, %47, %cst_23 [1] : vector<2x8x128xf32> to vector<2x128xf32>
    %49 = vector.shape_cast %48 : vector<2x128xf32> to vector<2x1x128xf32>
    %cst_24 = arith.constant 8.000000e+00 : f32
    %50 = vector.broadcast %cst_24 : f32 to vector<2x1x128xf32>
    %51 = arith.divf %49, %50 : vector<2x1x128xf32>
    %cst_25 = arith.constant 9.99999974E-6 : f32
    %52 = vector.broadcast %cst_25 : f32 to vector<2x1x128xf32>
    %53 = arith.addf %51, %52 : vector<2x1x128xf32>
    %54 = math.rsqrt %53 : vector<2x1x128xf32>
    %55 = vector.broadcast %54 : vector<2x1x128xf32> to vector<2x8x128xf32>
    %56 = arith.mulf %46, %55 : vector<2x8x128xf32>
    %57 = vector.shape_cast %3 : vector<1x128xf32> to vector<1x1x128xf32>
    %58 = vector.broadcast %57 : vector<1x1x128xf32> to vector<2x8x128xf32>
    %59 = arith.mulf %56, %58 : vector<2x8x128xf32>
    %60 = vector.shape_cast %4 : vector<1x128xf32> to vector<1x1x128xf32>
    %61 = vector.broadcast %60 : vector<1x1x128xf32> to vector<2x8x128xf32>
    %62 = arith.addf %59, %61 : vector<2x8x128xf32>
    %cst_26 = arith.constant 0.000000e+00 : f32
    %63 = vector.broadcast %cst_26 : f32 to vector<2x8x128xf32>
    %64 = arith.maximumf %62, %63 : vector<2x8x128xf32>
    %65 = vector.shape_cast %64 : vector<2x8x128xf32> to vector<16x128xf32>
    %c0_27 = arith.constant 0 : index
    %c0_28 = arith.constant 0 : index
    %66 = vector.load %arg3[%c0_27, %c0_28] : memref<128x128xbf16, #tpu.memory_space<vmem>>, vector<128x128xbf16>
    %67 = arith.truncf %65 : vector<16x128xf32> to vector<16x128xbf16>
    %cst_29 = arith.constant dense<0.000000e+00> : vector<16x128xf32>
    %68 = tpu.matmul %67, %66, %cst_29 {dimension_numbers = #tpu.dot_dimension_numbers<[1], [0], [0], [1], [0, 0, 1, 1], [], []>} : vector<16x128xbf16>, vector<128x128xbf16>, vector<16x128xf32> -> vector<16x128xf32>
    %69 = vector.broadcast %5 : vector<1x128xf32> to vector<16x128xf32>
    %70 = arith.addf %68, %69 : vector<16x128xf32>
    %cst_30 = arith.constant 0.000000e+00 : f32
    %71 = vector.broadcast %cst_30 : f32 to vector<16x128xf32>
    %72 = arith.maximumf %70, %71 : vector<16x128xf32>
    %c0_31 = arith.constant 0 : index
    %c0_32 = arith.constant 0 : index
    %73 = vector.load %arg4[%c0_31, %c0_32] : memref<128x128xbf16, #tpu.memory_space<vmem>>, vector<128x128xbf16>
    %74 = arith.truncf %72 : vector<16x128xf32> to vector<16x128xbf16>
    %cst_33 = arith.constant dense<0.000000e+00> : vector<16x128xf32>
    %75 = tpu.matmul %74, %73, %cst_33 {dimension_numbers = #tpu.dot_dimension_numbers<[1], [0], [0], [1], [0, 0, 1, 1], [], []>} : vector<16x128xbf16>, vector<128x128xbf16>, vector<16x128xf32> -> vector<16x128xf32>
    %76 = vector.broadcast %6 : vector<1x128xf32> to vector<16x128xf32>
    %77 = arith.addf %75, %76 : vector<16x128xf32>
    %78 = vector.extract_strided_slice %77 {offsets = [0, 0], sizes = [16, 64], strides = [1, 1]} : vector<16x128xf32> to vector<16x64xf32>
    %79 = vector.extract_strided_slice %77 {offsets = [0, 64], sizes = [16, 64], strides = [1, 1]} : vector<16x128xf32> to vector<16x64xf32>
    %c0_34 = arith.constant 0 : index
    %c0_35 = arith.constant 0 : index
    %80 = vector.load %arg5[%c0_34, %c0_35] : memref<128x64xbf16, #tpu.memory_space<vmem>>, vector<64x64xbf16>
    %81 = arith.truncf %78 : vector<16x64xf32> to vector<16x64xbf16>
    %cst_36 = arith.constant dense<0.000000e+00> : vector<16x64xf32>
    %82 = tpu.matmul %81, %80, %cst_36 {dimension_numbers = #tpu.dot_dimension_numbers<[1], [0], [0], [1], [0, 0, 1, 1], [], []>} : vector<16x64xbf16>, vector<64x64xbf16>, vector<16x64xf32> -> vector<16x64xf32>
    %83 = vector.broadcast %7 : vector<1x64xf32> to vector<16x64xf32>
    %84 = arith.addf %82, %83 : vector<16x64xf32>
    %cst_37 = arith.constant 0.000000e+00 : f32
    %85 = vector.broadcast %cst_37 : f32 to vector<16x64xf32>
    %86 = arith.maximumf %84, %85 : vector<16x64xf32>
    %c64 = arith.constant 64 : index
    %c0_38 = arith.constant 0 : index
    %87 = vector.load %arg5[%c64, %c0_38] : memref<128x64xbf16, #tpu.memory_space<vmem>>, vector<64x64xbf16>
    %88 = arith.truncf %86 : vector<16x64xf32> to vector<16x64xbf16>
    %cst_39 = arith.constant dense<0.000000e+00> : vector<16x64xf32>
    %89 = tpu.matmul %88, %87, %cst_39 {dimension_numbers = #tpu.dot_dimension_numbers<[1], [0], [0], [1], [0, 0, 1, 1], [], []>} : vector<16x64xbf16>, vector<64x64xbf16>, vector<16x64xf32> -> vector<16x64xf32>
    %90 = vector.broadcast %8 : vector<1x64xf32> to vector<16x64xf32>
    %91 = arith.addf %89, %90 : vector<16x64xf32>
    %92 = tpu.concatenate %91, %79 in 1 : vector<16x64xf32>, vector<16x64xf32> -> vector<16x128xf32>
    %c0_40 = arith.constant 0 : index
    %c0_41 = arith.constant 0 : index
    %93 = vector.load %arg7[%c0_40, %c0_41] : memref<16x128xf32, #tpu.memory_space<vmem>>, vector<16x128xf32>
    tpu.vector_store %arg7[%c0_40, %c0_41], %92 {strides = array<i32>} : memref<16x128xf32, #tpu.memory_space<vmem>>, vector<16x128xf32>,
    return
  }
}

</mosaic_0001>

<bundles_post_ra>
// kernel: _lambda_.1
= control target key start
LH: loop header
LB: loop body
LE: loop exit
PB: predicated region body
PF: predicated region fallthrough
CT: control target
= control target key end

     0   :  { %12 = vsyncpa [#allocation3], 0  ;;  %s1350_s0 = inlined_call_operand.vmem [shape: bf16[16,32], index: 0, kind: input, shape index: {}]   ;;  %s1351_s1 = inlined_call_operand.vmem [shape: bf16[32,256], index: 1, kind: input, shape index: {}]   ;;  %s1352_s2 = inlined_call_operand.vmem [shape: bf16[256,128], index: 2, kind: input, shape index: {}]   ;;  %s1353_s3 = inlined_call_operand.hbm [shape: bf16[128,128], index: 3, kind: input, shape index: {}]   ;;  %s1354_s4 = inlined_call_operand.hbm [shape: bf16[128,128], index: 4, kind: input, shape index: {}]   ;;  %s1355_s5 = inlined_call_operand.vmem [shape: bf16[128,64], index: 5, kind: input, shape index: {}]   ;;  %s1356_s6 = inlined_call_operand.vmem [shape: f32[8,256], index: 6, kind: input, shape index: {}]   ;;  %s1357_s7 = inlined_call_operand.vmem [shape: f32[16,128], index: 7, kind: output, shape index: {}]  }
   0x1   :  { %13 = vsyncpa [#allocation5], 0  ;;  %s1126_s24 = smov [#allocation2]   ;;  %s1078_s28 = scalar_lea.hbm %s1353_s3, 1024 }
   0x2   :  { %s25_s25 = sshll.u32 %s1126_s24, 4  ;;  %p1079_p0 = scmp.ne.s32.totalorder %s1353_s3, %s1078_s28  ;;  %s26_s25 = int_to_ptr.vmem [resolvable:$true] %s25_s25 }
   0x3   :  { %p1082_p1 = scmp.lt.u32.totalorder %s1078_s28, %s1353_s3 }
   0x5   :  { %p1084_p2 = pnand %p1082_p1, %p1079_p0 }
   0x7   :  { %1087 = shalt.err (!%p1084_p2)
}
   0x8   :  { %s1088_s10 = scalar_lea.vmem %s26_s25, 1024  ;;  %p1093_p4 = scmp.lt.s32.totalorder %s26_s25, %s26_s25 }
   0x9   :  { %p1089_p3 = scmp.ne.s32.totalorder %s26_s25, %s1088_s10  ;;  %p1094_p5 = scmp.lt.s32.totalorder %s1088_s10, %s1088_s10 }
   0xb   :  { %p1095_p6 = por %p1094_p5, %p1093_p4 }
   0xd   :  { %p1096_p7 = pnand %p1095_p6, %p1089_p3 }
   0xf   :  { %1099 = shalt.err (!%p1096_p7)
}
  0x10   :  { %s1127_s11 = smov 64   ;;  %s1128_s12 = smov 4  }
  0x11   :  { %31 = dma.hbm_to_vmem [thread:$0]  %s1353_s3, 1024, %s26_s25, [#allocation3], %s1127_s11, %s1127_s11, %s1128_s12  }
  0x12   :  { %s1129_s15 = smov [#allocation4]   ;;  %s1100_s19 = scalar_lea.hbm %s1354_s4, 1024 }
  0x13   :  { %s37_s16 = sshll.u32 %s1129_s15, 4  ;;  %p1101_p8 = scmp.ne.s32.totalorder %s1354_s4, %s1100_s19  ;;  %s38_s16 = int_to_ptr.vmem [resolvable:$true] %s37_s16 }
  0x14   :  { %p1104_p9 = scmp.lt.u32.totalorder %s1100_s19, %s1354_s4 }
  0x16   :  { %p1106_p10 = pnand %p1104_p9, %p1101_p8 }
  0x18   :  { %1109 = shalt.err (!%p1106_p10)
}
  0x19   :  { %s1110_s24 = scalar_lea.vmem %s38_s16, 1024  ;;  %p1115_p12 = scmp.lt.s32.totalorder %s38_s16, %s38_s16 }
  0x1a   :  { %p1111_p11 = scmp.ne.s32.totalorder %s38_s16, %s1110_s24  ;;  %p1116_p13 = scmp.lt.s32.totalorder %s1110_s24, %s1110_s24 }
  0x1c   :  { %p1117_p0 = por %p1116_p13, %p1115_p12 }
  0x1e   :  { %p1118_p1 = pnand %p1117_p0, %p1111_p11 }
  0x20   :  { %1121 = shalt.err (!%p1118_p1)
}
  0x21   :  { %43 = dma.hbm_to_vmem [thread:$0]  %s1354_s4, 1024, %s38_s16, [#allocation5], %s1127_s11, %s1127_s11, %s1128_s12  }
  0x22   :  { %1122 = dma.done.wait [#allocation3], 1024  }
  0x23   :  { %1123 = vsyncadd [#allocation3], 4294966272 }
  0x24   :  { %1124 = dma.done.wait [#allocation5], 1024  }
  0x25   :  { %1125 = vsyncadd [#allocation5], 4294966272  ;;  %v1130_v0 = vmov 0   ;;  %v1019_v1 = vld [vmem:[%s1351_s1 + $0x4] ss:$8 sps:$4 sm:$0xff]   ;;  %vm95_vm0 = vcmask 261120  }
  0x26   :  { %131 = vmatprep.mubr.bf16.mxu0 %v1130_v0  ;;  %v1021_v2 = vld [vmem:[%s1351_s1] ss:$8 sps:$4 sm:$0xff]   ;;  %99 = vmatprep.subr.bf16.mxu0 %v1019_v1  ;;  %v1022_v3 = vld [vmem:[%s1351_s1 + $0x14] ss:$8 sps:$4 sm:$0xff]   ;;  %v1024_v4 = vld [vmem:[%s1351_s1 + $0x10] ss:$8 sps:$4 sm:$0xff]  }
  0x27   :  { %100 = vmatpush1.bf16.msra.mxu0 %v1021_v2  ;;  %v1025_v5 = vld [vmem:[%s1350_s0] sm:$0xff]   ;;  %v1028_v8 = vld [vmem:[%s1352_s2 + $0x48] sm:$0xff]   ;;  %v1030_v10 = vld [vmem:[%s1352_s2 + $0x50] sm:$0xff]   ;;  %vm1132_vm1 = vmmov 0   ;;  %vm715_vm2 = vcmask 523264  }
  0x28   :  { %101 = vmatprep.subr.bf16.mxu0 %v1022_v3  ;;  %v1026_v6 = vld [vmem:[%s1352_s2 + $0x40] sm:$0xff]   ;;  %v1029_v9 = vld [vmem:[%s1352_s2 + $0x8] sm:$0xff]   ;;  %v1031_v11 = vld [vmem:[%s1352_s2 + $0x10] sm:$0xff]  }
  0x29   :  { %v1027_v7 = vld [vmem:[%s1352_s2] sm:$0xff]   ;;  %898 = vmatprep.subr.bf16.mxu1 %v1026_v6  ;;  %v1032_v12 = vld [vmem:[%s1352_s2 + $0x58] sm:$0xff]   ;;  %v1036_v16 = vld [vmem:[%s1352_s2 + $0x68] sm:$0xff]  }
  0x2a   :  { %899 = vmatpush3.bf16.msra.mxu1 %v1027_v7  ;;  %v1033_v13 = vld [vmem:[%s1352_s2 + $0x18] sm:$0xff]   ;;  %v1034_v14 = vld [vmem:[%s1352_s2 + $0x60] sm:$0xff]   ;;  %v1037_v17 = vld [vmem:[%s1352_s2 + $0x28] sm:$0xff]  }
  0x2b   :  { %102 = vmatpush1.bf16.msra.mxu0 %v1024_v4  ;;  %900 = vmatprep.subr.bf16.mxu1 %v1028_v8  ;;  %v1035_v15 = vld [vmem:[%s1352_s2 + $0x20] sm:$0xff]   ;;  %v1038_v18 = vld [vmem:[%s1352_s2 + $0x70] sm:$0xff]   ;;  %v1040_v20 = vld [vmem:[%s1352_s2 + $0x78] sm:$0xff]  }
  0x2c   :  { %v1039_v19 = vld [vmem:[%s1352_s2 + $0x30] sm:$0xff]   ;;  %v1041_v21 = vld [vmem:[%s1352_s2 + $0x38] sm:$0xff]  }
  0x2e   :  { %855 = vmatmul.mubr.msk.bf16.vlgmr.msra.gmra.mrb[0].mxu0 %vm95_vm0, %v1025_v5  ;;  %901 = vmatpush3.bf16.msra.mxu1 %v1029_v9 }
  0x2f   :  { %902 = vmatprep.subr.bf16.mxu1 %v1030_v10 }
  0x32   :  { %903 = vmatpush3.bf16.msra.mxu1 %v1031_v11 }
  0x33   :  { %904 = vmatprep.subr.bf16.mxu1 %v1032_v12 }
  0x36   :  { %905 = vmatpush3.bf16.msra.mxu1 %v1033_v13 }
  0x37   :  { %906 = vmatprep.subr.bf16.mxu1 %v1034_v14 }
  0x3a   :  { %907 = vmatpush3.bf16.msra.mxu1 %v1035_v15 }
  0x3b   :  { %908 = vmatprep.subr.bf16.mxu1 %v1036_v16 }
  0x3e   :  { %909 = vmatpush3.bf16.msra.mxu1 %v1037_v17 }
  0x3f   :  { %910 = vmatprep.subr.bf16.mxu1 %v1038_v18 }
  0x42   :  { %911 = vmatpush3.bf16.msra.mxu1 %v1039_v19 }
  0x43   :  { %912 = vmatprep.subr.bf16.mxu1 %v1040_v20 }
  0x46   :  { %913 = vmatpush3.bf16.msra.mxu1 %v1041_v21 }
 0x101   :  { %v133_v22 = vpop.f32.mrb[0].mxu0 }
 0x102   :  { %v142_v23 = vrot.slane %v133_v22, 4  ;;  %v135_v24 = vpop.f32.mrb[1].mxu0 }
 0x103   :  { %v148_v25 = vrot.slane %v135_v24, 4  ;;  %v137_v26 = vpop.f32.mrb[2].mxu0 }
 0x104   :  { %v143_v27 = vadd.f32 %v142_v23, %v133_v22  ;;  %v154_v28 = vrot.slane %v137_v26, 4  ;;  %v139_v29 = vpop.f32.mrb[3].mxu0 }
 0x105   :  { %v149_v30 = vadd.f32 %v148_v25, %v135_v24  ;;  %v160_v31 = vrot.slane %v139_v29, 4 }
 0x106   :  { %v144_v32 = vrot.slane %v143_v27, 2  ;;  %v155_v33 = vadd.f32 %v154_v28, %v137_v26 }
 0x107   :  { %v150_v34 = vrot.slane %v149_v30, 2  ;;  %v161_v35 = vadd.f32 %v160_v31, %v139_v29 }
 0x108   :  { %v145_v36 = vadd.f32 %v144_v32, %v143_v27  ;;  %v156_v37 = vrot.slane %v155_v33, 2 }
 0x109   :  { %v151_v38 = vadd.f32 %v150_v34, %v149_v30  ;;  %v162_v39 = vrot.slane %v161_v35, 2 }
 0x10a   :  { %v146_v40 = vrot.slane %v145_v36, 1  ;;  %v157_v41 = vadd.f32 %v156_v37, %v155_v33  ;;  %v57_v33 = vld [vmem:[%s1356_s6] ss:$8 sm:$0x3] }
 0x10b   :  { %v152_v42 = vrot.slane %v151_v38, 1  ;;  %v163_v43 = vadd.f32 %v162_v39, %v161_v35  ;;  %v849_v35 = vld [vmem:[%s1356_s6 + $0x1] ss:$8 sm:$0x3] }
 0x10c   :  { %v147_v44 = vadd.f32 %v146_v40, %v145_v36  ;;  %v158_v45 = vrot.slane %v157_v41, 1 }
 0x10d   :  { %v153_v46 = vadd.f32 %v152_v42, %v151_v38  ;;  %v164_v47 = vrot.slane %v163_v43, 1 }
 0x10e   :  { %v167_v48 = vmul.f32 0.125, %v147_v44  ;;  %v159_v49 = vadd.f32 %v158_v45, %v157_v41 }
 0x10f   :  { %v168_v50 = vmul.f32 0.125, %v153_v46  ;;  %v165_v51 = vadd.f32 %v164_v47, %v163_v43 }
 0x110   :  { %v171_v52 = vsub.f32 %v133_v22, %v167_v48  ;;  %v169_v53 = vmul.f32 0.125, %v159_v49  ;;  %v220_v22 = vlaneseq }
 0x111   :  { %v172_v54 = vsub.f32 %v135_v24, %v168_v50  ;;  %v170_v55 = vmul.f32 0.125, %v165_v51 }
 0x112   :  { %v175_v56 = vmul.f32 %v171_v52, %v171_v52  ;;  %v173_v57 = vsub.f32 %v137_v26, %v169_v53  ;;  %v221_v30 = vshrl.u32 %v220_v22, 7 }
 0x113   :  { %v176_v58 = vmul.f32 %v172_v54, %v172_v54  ;;  %v174_v59 = vsub.f32 %v139_v29, %v170_v55 }
 0x114   :  { %v179_v60 = vrot.slane %v175_v56, 4  ;;  %v177_v61 = vmul.f32 %v173_v57, %v173_v57  ;;  %v222_v32 = vsub.s32 0, %v221_v30  ;;  %v226_v34 = vsub.s32 1, %v221_v30 }
 0x115   :  { %v185_v62 = vrot.slane %v176_v58, 4  ;;  %v178_v63 = vmul.f32 %v174_v59, %v174_v59 }
 0x116   :  { %v180_v0 = vadd.f32 %v179_v60, %v175_v56  ;;  %v191_v1 = vrot.slane %v177_v61, 4  ;;  %v223_v36 = vrot.slane %v57_v33, %v222_v32  ;;  %v227_v38 = vrot.slane %v57_v33, %v226_v34 }
 0x117   :  { %v186_v2 = vadd.f32 %v185_v62, %v176_v58  ;;  %v197_v3 = vrot.slane %v178_v63, 4  ;;  %v238_v41 = vrot.slane %v849_v35, %v222_v32  ;;  %v242_v44 = vrot.slane %v849_v35, %v226_v34 }
 0x118   :  { %v181_v4 = vrot.slane %v180_v0, 2  ;;  %v192_v5 = vadd.f32 %v191_v1, %v177_v61  ;;  %v1131_v1 = vmov 0.0  }
 0x119   :  { %v187_v6 = vrot.slane %v186_v2, 2  ;;  %v198_v7 = vadd.f32 %v197_v3, %v178_v63  ;;  %948 = vmatprep.subr.bf16.mxu0 %v1131_v1  ;;  %968 = vmatprep.subr.bf16.mxu1 %v1131_v1  ;;  %v1046_v3 = vld [vmem:[#allocation2 + $0x20] sm:$0xff]  }
 0x11a   :  { %v182_v8 = vadd.f32 %v181_v4, %v180_v0  ;;  %v193_v9 = vrot.slane %v192_v5, 2  ;;  %v1047_v4 = vld [vmem:[#allocation2 + $0x28] sm:$0xff]   ;;  %964 = vmatprep.mubr.msk.bf16.mxu0 %vm1132_vm1, %v1131_v1 }
 0x11b   :  { %v188_v10 = vadd.f32 %v187_v6, %v186_v2  ;;  %v199_v11 = vrot.slane %v198_v7, 2  ;;  %v1045_v2 = vld [vmem:[#allocation2 + $0x18] sm:$0xff]  }
 0x11c   :  { %v183_v12 = vrot.slane %v182_v8, 1  ;;  %v194_v13 = vadd.f32 %v193_v9, %v192_v5  ;;  %v1048_v5 = vld [vmem:[#allocation2 + $0x30] sm:$0xff]   ;;  %v1049_v6 = vld [vmem:[#allocation2 + $0x38] sm:$0xff]  }
 0x11d   :  { %v189_v14 = vrot.slane %v188_v10, 1  ;;  %v200_v15 = vadd.f32 %v199_v11, %v198_v7  ;;  %v1050_v7 = vld [vmem:[#allocation4] sm:$0xff]   ;;  %v1052_v9 = vld [vmem:[#allocation4 + $0x10] sm:$0xff]  }
 0x11e   :  { %v184_v16 = vadd.f32 %v183_v12, %v182_v8  ;;  %v195_v17 = vrot.slane %v194_v13, 1  ;;  %v1051_v8 = vld [vmem:[#allocation4 + $0x8] sm:$0xff]   ;;  %v1054_v11 = vld [vmem:[#allocation4 + $0x20] sm:$0xff]  }
 0x11f   :  { %v190_v18 = vadd.f32 %v189_v14, %v188_v10  ;;  %v201_v19 = vrot.slane %v200_v15, 1  ;;  %v1053_v10 = vld [vmem:[#allocation4 + $0x18] sm:$0xff]   ;;  %v1055_v12 = vld [vmem:[#allocation4 + $0x28] sm:$0xff]  }
 0x120   :  { %v203_v20 = vmul.f32 0.125, %v184_v16  ;;  %v196_v21 = vadd.f32 %v195_v17, %v194_v13 }
 0x121   :  { %v204_v23 = vmul.f32 0.125, %v190_v18  ;;  %v202_v24 = vadd.f32 %v201_v19, %v200_v15 }
 0x122   :  { %v207_v25 = vadd.f32 1e-05, %v203_v20  ;;  %v205_v26 = vmul.f32 0.125, %v196_v21 }
 0x123   :  { %v208_v27 = vadd.f32 1e-05, %v204_v23  ;;  %v206_v28 = vmul.f32 0.125, %v202_v24 }
 0x124   :  { %1066 = vrsqrt.f32 %v207_v25  ;;  %v209_v29 = vadd.f32 1e-05, %v205_v26 }
 0x125   :  { %1068 = vrsqrt.f32 %v208_v27  ;;  %v210_v31 = vadd.f32 1e-05, %v206_v28 }
 0x126   :  { %1070 = vrsqrt.f32 %v209_v29 }
 0x127   :  { %1072 = vrsqrt.f32 %v210_v31 }
 0x12e   :  { %v1067_v37 = vpop.eup %1066 }
 0x12f   :  { %v1069_v39 = vpop.eup %1068  ;;  %v215_v40 = vmul.f32 %v1067_v37, %v171_v52 }
 0x130   :  { %v1071_v42 = vpop.eup %1070  ;;  %v216_v43 = vmul.f32 %v1069_v39, %v172_v54  ;;  %v1042_v54 = vld [vmem:[#allocation2] sm:$0xff]  }
 0x131   :  { %v1073_v45 = vpop.eup %1072  ;;  %v230_v46 = vmul.f32 %v223_v36, %v215_v40  ;;  %v217_v47 = vmul.f32 %v1071_v42, %v173_v57  ;;  %949 = vmatpush3.bf16.msra.mxu0 %v1042_v54  ;;  %v1043_v57 = vld [vmem:[#allocation2 + $0x8] sm:$0xff]  }
 0x132   :  { %v218_v48 = vmul.f32 %v1073_v45, %v174_v59  ;;  %v231_v49 = vmul.f32 %v227_v38, %v216_v43  ;;  %950 = vmatprep.subr.bf16.mxu0 %v1131_v1  ;;  %v1044_v59 = vld [vmem:[#allocation2 + $0x10] sm:$0xff]  }
 0x133   :  { %v232_v50 = vmul.f32 %v223_v36, %v217_v47  ;;  %v245_v51 = vadd.f32 %v238_v41, %v230_v46 }
 0x134   :  { %v233_v53 = vmul.f32 %v227_v38, %v218_v48  ;;  %v246_v55 = vadd.f32 %v242_v44, %v231_v49 }
 0x135   :  { %v247_v56 = vadd.f32 %v238_v41, %v232_v50  ;;  %v249_v60 = vmax.f32 %v245_v51, 0.0  ;;  %951 = vmatpush3.bf16.msra.mxu0 %v1043_v57 }
 0x136   :  { %v248_v58 = vadd.f32 %v242_v44, %v233_v53  ;;  %v250_v62 = vmax.f32 %v246_v55, 0.0  ;;  %952 = vmatprep.subr.bf16.mxu0 %v1131_v1 }
 0x137   :  { %v251_v61 = vmax.f32 %v247_v56, 0.0  ;;  %v60_v56 = vld [vmem:[%s1356_s6 + $0x2] ss:$0 sm:$0xff] }
 0x138   :  { %v252_v63 = vmax.f32 %v248_v58, 0.0 }
 0x139   :  { %v285_v52 = vpack.c.bf16 %v251_v61, %v249_v60  ;;  %953 = vmatpush3.bf16.msra.mxu0 %v1044_v59  ;;  %v61_v61 = vld [vmem:[%s1356_s6 + $0x3] ss:$0 sm:$0xff] }
 0x13a   :  { %v286_v0 = vpack.c.bf16 %v252_v63, %v250_v62  ;;  %954 = vmatprep.subr.bf16.mxu0 %v1131_v1 }
 0x13c   :  { %415 = vmatprep.mubr.bf16.mxu1 %v286_v0 }
 0x13d   :  { %416 = vmatmul.mubr.bf16.vlgmr.msra.gmra.mrb[0].mxu1 %v285_v52  ;;  %955 = vmatpush3.bf16.msra.mxu0 %v1045_v2 }
 0x13e   :  { %956 = vmatprep.subr.bf16.mxu0 %v1131_v1  ;;  %984 = vmatprep.mubr.msk.bf16.mxu1 %vm1132_vm1, %v1131_v1 }
 0x13f   :  { %969 = vmatpush3.bf16.msra.mxu1 %v1050_v7  ;;  %v62_v7 = vld [vmem:[%s1356_s6 + $0x4] ss:$0 sm:$0xff] }
 0x140   :  { %970 = vmatprep.subr.bf16.mxu1 %v1131_v1 }
 0x141   :  { %957 = vmatpush3.bf16.msra.mxu0 %v1046_v3  ;;  %v1056_v3 = vld [vmem:[#allocation4 + $0x30] sm:$0xff]  }
 0x142   :  { %958 = vmatprep.subr.bf16.mxu0 %v1131_v1 }
 0x143   :  { %971 = vmatpush3.bf16.msra.mxu1 %v1051_v8 }
 0x144   :  { %972 = vmatprep.subr.bf16.mxu1 %v1131_v1 }
 0x145   :  { %959 = vmatpush3.bf16.msra.mxu0 %v1047_v4  ;;  %v1057_v4 = vld [vmem:[#allocation4 + $0x38] sm:$0xff]  }
 0x146   :  { %960 = vmatprep.subr.bf16.mxu0 %v1131_v1 }
 0x147   :  { %973 = vmatpush3.bf16.msra.mxu1 %v1052_v9 }
 0x148   :  { %974 = vmatprep.subr.bf16.mxu1 %v1131_v1 }
 0x149   :  { %961 = vmatpush3.bf16.msra.mxu0 %v1048_v5  ;;  %v1058_v5 = vld [vmem:[%s1355_s5] sm:$0xff]  }
 0x14a   :  { %962 = vmatprep.subr.bf16.mxu0 %v1131_v1 }
 0x14b   :  { %975 = vmatpush3.bf16.msra.mxu1 %v1053_v10 }
 0x14c   :  { %976 = vmatprep.subr.bf16.mxu1 %v1131_v1 }
 0x14d   :  { %963 = vmatpush3.bf16.msra.mxu0 %v1049_v6  ;;  %v1059_v6 = vld [vmem:[%s1355_s5 + $0x8] sm:$0xff]  }
 0x14e   :  { %988 = vmatprep.subr.bf16.mxu0 %v1131_v1 }
 0x14f   :  { %977 = vmatpush3.bf16.msra.mxu1 %v1054_v11 }
 0x150   :  { %978 = vmatprep.subr.bf16.mxu1 %v1131_v1 }
 0x153   :  { %979 = vmatpush3.bf16.msra.mxu1 %v1055_v12 }
 0x154   :  { %980 = vmatprep.subr.bf16.mxu1 %v1131_v1 }
 0x157   :  { %981 = vmatpush3.bf16.msra.mxu1 %v1056_v3 }
 0x158   :  { %982 = vmatprep.subr.bf16.mxu1 %v1131_v1 }
 0x15b   :  { %983 = vmatpush3.bf16.msra.mxu1 %v1057_v4 }
 0x210   :  { %v914_v13 = vpop.f32.mrb[0].mxu1 }
 0x211   :  { %v915_v14 = vpop.f32.mrb[1].mxu1 }
 0x212   :  { %v916_v15 = vadd.f32 %v915_v14, %v914_v13  ;;  %v917_v16 = vpop.f32.mrb[2].mxu1 }
 0x213   :  { %v918_v17 = vpop.f32.mrb[3].mxu1 }
 0x214   :  { %v424_v18 = vrot.slane %v916_v15, 4  ;;  %v919_v19 = vadd.f32 %v918_v17, %v917_v16  ;;  %v1060_v17 = vld [vmem:[%s1355_s5 + $0x10] sm:$0xff]  }
 0x216   :  { %v425_v20 = vadd.f32 %v916_v15, %v424_v18  ;;  %v430_v21 = vrot.slane %v919_v19, 4  ;;  %v1061_v18 = vld [vmem:[%s1355_s5 + $0x18] sm:$0xff]  }
 0x218   :  { %v426_v22 = vrot.slane %v425_v20, 2  ;;  %v431_v23 = vadd.f32 %v919_v19, %v430_v21 }
 0x21a   :  { %v427_v24 = vadd.f32 %v426_v22, %v425_v20  ;;  %v432_v25 = vrot.slane %v431_v23, 2 }
 0x21c   :  { %v428_v26 = vrot.slane %v427_v24, 1  ;;  %v433_v27 = vadd.f32 %v432_v25, %v431_v23 }
 0x21e   :  { %v429_v28 = vadd.f32 %v428_v26, %v427_v24  ;;  %v434_v29 = vrot.slane %v433_v27, 1  ;;  %v1062_v26 = vld [vmem:[%s1355_s5 + $0x20] sm:$0xff]  }
 0x220   :  { %v436_v30 = vmul.f32 0.125, %v429_v28  ;;  %v435_v31 = vadd.f32 %v434_v29, %v433_v27  ;;  %v1063_v28 = vld [vmem:[%s1355_s5 + $0x28] sm:$0xff]   ;;  %v1064_v29 = vld [vmem:[%s1355_s5 + $0x30] sm:$0xff]  }
 0x222   :  { %v438_v32 = vsub.f32 %v916_v15, %v436_v30  ;;  %v437_v33 = vmul.f32 0.125, %v435_v31  ;;  %v1065_v30 = vld [vmem:[%s1355_s5 + $0x38] sm:$0xff]   ;;  %v64_v31 = vld [vmem:[%s1356_s6 + $0x6] ss:$0 sm:$0xff] }
 0x224   :  { %v440_v34 = vmul.f32 %v438_v32, %v438_v32  ;;  %v439_v35 = vsub.f32 %v919_v19, %v437_v33  ;;  %v63_v19 = vld [vmem:[%s1356_s6 + $0x5] ss:$0 sm:$0xff] }
 0x226   :  { %v442_v36 = vrot.slane %v440_v34, 4  ;;  %v441_v37 = vmul.f32 %v439_v35, %v439_v35 }
 0x228   :  { %v443_v38 = vadd.f32 %v442_v36, %v440_v34  ;;  %v448_v39 = vrot.slane %v441_v37, 4 }
 0x22a   :  { %v444_v40 = vrot.slane %v443_v38, 2  ;;  %v449_v41 = vadd.f32 %v448_v39, %v441_v37 }
 0x22c   :  { %v445_v42 = vadd.f32 %v444_v40, %v443_v38  ;;  %v450_v43 = vrot.slane %v449_v41, 2 }
 0x22e   :  { %v446_v44 = vrot.slane %v445_v42, 1  ;;  %v451_v45 = vadd.f32 %v450_v43, %v449_v41 }
 0x230   :  { %v447_v46 = vadd.f32 %v446_v44, %v445_v42  ;;  %v452_v47 = vrot.slane %v451_v45, 1 }
 0x232   :  { %v454_v48 = vmul.f32 0.125, %v447_v46  ;;  %v453_v49 = vadd.f32 %v452_v47, %v451_v45 }
 0x234   :  { %v456_v50 = vadd.f32 1e-05, %v454_v48  ;;  %v455_v51 = vmul.f32 0.125, %v453_v49 }
 0x236   :  { %1074 = vrsqrt.f32 %v456_v50  ;;  %v457_v53 = vadd.f32 1e-05, %v455_v51 }
 0x238   :  { %1076 = vrsqrt.f32 %v457_v53 }
 0x240   :  { %v1075_v55 = vpop.eup %1074 }
 0x241   :  { %v460_v58 = vmul.f32 %v1075_v55, %v438_v32 }
 0x242   :  { %v1077_v60 = vpop.eup %1076 }
 0x243   :  { %v462_v62 = vmul.f32 %v460_v58, %v60_v56  ;;  %v461_v63 = vmul.f32 %v1077_v60, %v439_v35 }
 0x245   :  { %v463_v52 = vmul.f32 %v461_v63, %v60_v56  ;;  %v464_v0 = vadd.f32 %v462_v62, %v61_v61 }
 0x247   :  { %v465_v54 = vadd.f32 %v463_v52, %v61_v61  ;;  %v466_v57 = vmax.f32 %v464_v0, 0.0 }
 0x249   :  { %v467_v59 = vmax.f32 %v465_v54, 0.0 }
 0x24b   :  { %v484_v2 = vpack.c.bf16 %v467_v59, %v466_v57 }
 0x24d   :  { %965 = vmatmul.mubr.bf16.vlgmr.msra.gmra.mrb[4].mxu0 %v484_v2 }
 0x24e   :  { %996 = vmatprep.mubr.msk.bf16.mxu0 %vm1132_vm1, %v1131_v1  ;;  %989 = vmatpush3.bf16.msra.mxu0 %v1058_v5 }
 0x24f   :  { %990 = vmatprep.subr.bf16.mxu0 %v1131_v1 }
 0x252   :  { %991 = vmatpush3.bf16.msra.mxu0 %v1059_v6 }
 0x253   :  { %992 = vmatprep.subr.bf16.mxu0 %v1131_v1 }
 0x256   :  { %993 = vmatpush3.bf16.msra.mxu0 %v1060_v17 }
 0x257   :  { %994 = vmatprep.subr.bf16.mxu0 %v1131_v1 }
 0x25a   :  { %995 = vmatpush3.bf16.msra.mxu0 %v1061_v18 }
 0x25b   :  { %1000 = vmatprep.subr.bf16.mxu0 %v1131_v1 }
 0x320   :  { %v567_v8 = vpop.f32.mrb[4].mxu0 }
 0x321   :  { %v568_v9 = vadd.f32 %v567_v8, %v62_v7  ;;  %v966_v10 = vpop.f32.mrb[5].mxu0 }
 0x322   :  { %v570_v11 = vpop.f32.mrb[6].mxu0 }
 0x323   :  { %v571_v12 = vadd.f32 %v570_v11, %v62_v7  ;;  %v967_v13 = vpop.f32.mrb[7].mxu0  ;;  %v574_v14 = vmax.f32 %v568_v9, 0.0 }
 0x325   :  { %v575_v15 = vmax.f32 %v571_v12, 0.0 }
 0x327   :  { %v592_v16 = vpack.c.bf16 %v575_v15, %v574_v14 }
 0x329   :  { %985 = vmatmul.mubr.bf16.vlgmr.msra.gmra.mrb[4].mxu1 %v592_v16 }
 0x3fc   :  { %v675_v20 = vpop.f32.mrb[4].mxu1 }
 0x3fd   :  { %v986_v21 = vpop.f32.mrb[5].mxu1  ;;  %v676_v23 = vadd.f32 %v675_v20, %v63_v19 }
 0x3fe   :  { %v678_v22 = vpop.f32.mrb[6].mxu1 }
 0x3ff   :  { %v679_v24 = vadd.f32 %v678_v22, %v63_v19  ;;  %v987_v25 = vpop.f32.mrb[7].mxu1 }
 0x401   :  { %v690_v27 = vpack.c.bf16 %v679_v24, %v676_v23 }
 0x403   :  { %997 = vmatmul.mubr.msk.bf16.vlgmr.msra.gmra.mrb[8].mxu0 %vm715_vm2, %v690_v27 }
 0x404   :  { %1001 = vmatpush3.bf16.msra.mxu0 %v1062_v26  ;;  %1008 = vmatprep.mubr.msk.bf16.mxu0 %vm1132_vm1, %v1131_v1 }
 0x405   :  { %1002 = vmatprep.subr.bf16.mxu0 %v1131_v1 }
 0x408   :  { %1003 = vmatpush3.bf16.msra.mxu0 %v1063_v28 }
 0x409   :  { %1004 = vmatprep.subr.bf16.mxu0 %v1131_v1 }
 0x40c   :  { %1005 = vmatpush3.bf16.msra.mxu0 %v1064_v29 }
 0x40d   :  { %1006 = vmatprep.subr.bf16.mxu0 %v1131_v1  ;;  %v65_v1 = vld [vmem:[%s1356_s6 + $0x7] ss:$0 sm:$0xff] }
 0x410   :  { %1007 = vmatpush3.bf16.msra.mxu0 %v1065_v30 }
 0x4d6   :  { %v753_v32 = vpop.f32.mrb[8].mxu0 }
 0x4d7   :  { %v754_v33 = vadd.f32 %v753_v32, %v64_v31  ;;  %v998_v34 = vpop.f32.mrb[9].mxu0 }
 0x4d8   :  { %v756_v35 = vpop.f32.mrb[10].mxu0 }
 0x4d9   :  { %v757_v36 = vadd.f32 %v756_v35, %v64_v31  ;;  %v999_v37 = vpop.f32.mrb[11].mxu0  ;;  %v760_v38 = vmax.f32 %v754_v33, 0.0 }
 0x4db   :  { %v761_v39 = vmax.f32 %v757_v36, 0.0 }
 0x4dd   :  { %v770_v40 = vpack.c.bf16 %v761_v39, %v760_v38 }
 0x4df   :  { %1009 = vmatmul.mubr.msk.bf16.vlgmr.msra.gmra.mrb[12].mxu0 %vm715_vm2, %v770_v40 }
 0x5b2   :  { %v832_v41 = vpop.f32.mrb[12].mxu0 }
 0x5b3   :  { %v833_v42 = vadd.f32 %v832_v41, %v65_v1  ;;  %v1010_v43 = vpop.f32.mrb[13].mxu0 }
 0x5b4   :  { %v835_v44 = vpop.f32.mrb[14].mxu0 }
 0x5b5   :  { %v839_v45 = vsel %vm715_vm2, %v833_v42, %v676_v23  ;;  %v836_v46 = vadd.f32 %v835_v44, %v65_v1  ;;  %v1011_v47 = vpop.f32.mrb[15].mxu0 }
 0x5b6   :  { %841 = vst [vmem:[%s1357_s7] sm:$0xff] %v839_v45 }
 0x5b7   :  { %v840_v48 = vsel %vm715_vm2, %v836_v46, %v679_v24 }
 0x5b8   :  { %842 = vst [vmem:[%s1357_s7 + $0x8] sm:$0xff] %v840_v48 }
 0x5b9   :  { %847 = vsyncpa [#allocation3], 1 }
 0x5ba   :  { %848 = vsyncpa [#allocation5], 1 }

</bundles_post_ra>
